<compile_context>
chip_gen: v7x
topology: tpu7x:2x2x1
jax: 0.10.0
libtpu: 0.0.40
codegen_flags: <defaults>
</compile_context>

<pallas_src>
import math

import jax
import jax.numpy as jnp
from jax.experimental import pallas as pl
from jax.experimental.pallas import tpu as pltpu


_LANES = 512  # lane width of each tile (multiple of 128)


def _round_up(v, m):
    return ((v + m - 1) // m) * m


# ----------------------------------------------------------------------------
# Pallas kernel
#   tm_ref  : (12,)       SMEM -- [R row-major (9), p (3)]
#   pts_ref : (3, TM, L)  VMEM -- pts_ref[c] is a dense (TM, L) tile of the
#                                 c-th coordinate
#   out_ref : (3, TM, L)  VMEM
# out[c] = R[c,0]*x + R[c,1]*y + R[c,2]*z + p[c]
# K = 3 is far too small for the MXU; the ~18 VPU ops/point run on dense
# tiles, so the kernel is HBM-bound on every generation.
# ----------------------------------------------------------------------------
def _warp_kernel(tm_ref, pts_ref, out_ref):
    x = pts_ref[0]                       # (TM, L) dense tile
    y = pts_ref[1]
    z = pts_ref[2]
    for c in range(3):                   # static unroll; scalar SMEM broadcasts
        out_ref[c] = (tm_ref[3 * c + 0] * x
                      + tm_ref[3 * c + 1] * y
                      + tm_ref[3 * c + 2] * z
                      + tm_ref[9 + c])


def _choose_tile_rows(n_rows, lanes):
    """Rows per block: multiple of 8, ~1.5 MiB per block, >=4 grid steps if possible."""
    if n_rows <= 8:
        return n_rows                    # block dim == full array dim is allowed
    bytes_per_row = 3 * lanes * 4
    tm_bytes = max(8, ((1536 * 1024) // bytes_per_row) // 8 * 8)
    tm_steps = max(8, _round_up(pl.cdiv(n_rows, 4), 8))
    tm = min(tm_bytes, tm_steps)
    return max(8, min(tm, (n_rows // 8) * 8))


def warp_points_soa(pts_soa3, tmat):
    """pts_soa3: (3, n_rows, L) f32 SoA view; tmat: (12,) = [R row-major, p]."""
    _, n_rows, lanes = pts_soa3.shape
    tm = _choose_tile_rows(n_rows, lanes)
    grid = (pl.cdiv(n_rows, tm),)

    block_bytes = 3 * tm * lanes * 4
    # in + out, double-buffered, plus slack; clamp to a range safe on v5e/v6e/v7x.
    vmem_limit = min(max(4 * block_bytes + (1 << 20), 16 << 20), 48 << 20)
    n_pts = n_rows * lanes

    return pl.pallas_call(
        _warp_kernel,
        out_shape=jax.ShapeDtypeStruct((3, n_rows, lanes), jnp.float32),
        grid=grid,
        in_specs=[
            pl.BlockSpec(memory_space=pltpu.MemorySpace.SMEM),     # 12 scalars
            pl.BlockSpec((3, tm, lanes), lambda i: (0, i, 0)),
        ],
        out_specs=pl.BlockSpec((3, tm, lanes), lambda i: (0, i, 0)),
        compiler_params=pltpu.CompilerParams(
            dimension_semantics=("parallel",),
            vmem_limit_bytes=vmem_limit,
        ),
        cost_estimate=pl.CostEstimate(
            flops=18 * n_pts, transcendentals=0, bytes_accessed=24 * n_pts),
    )(tmat, pts_soa3)


def warp_points(pts, tmat, *, lanes=_LANES):
    """pts: (N, 3) f32 AoS; tmat: (12,) f32. Returns warped (N, 3) f32."""
    n = pts.shape[0]
    n_pad = _round_up(max(n, 1), lanes)
    if n_pad != n:
        # Lane-remainder pad of the small AoS input; XLA fuses this into the
        # transpose copy below (no standalone pass over the SoA array).
        pts = jnp.pad(pts, ((0, n_pad - n), (0, 0)))
    n_rows = n_pad // lanes
    # The only unavoidable layout pass given the (N, 3) API: AoS -> SoA
    # transpose.  The reshape to (3, n_rows, L) is free (row-major view).
    pts_soa3 = pts.T.reshape(3, n_rows, lanes)
    out = warp_points_soa(pts_soa3, tmat)              # (3, n_rows, L)
    # SoA -> AoS; the [:n] slice fuses into the transpose copy.
    return out.reshape(3, n_pad).T[:n]


# ----------------------------------------------------------------------------
# Plain-JAX pieces (tiny; run inside the same jit region as the Pallas call).
# ----------------------------------------------------------------------------
def mlp_forward(x, params):
    # x: (1, 6). net_depth=4, width=64, skip (concat input) feeding layer 3.
    w0, b0, w1, b1, w2, b2, w3, b3, wo, bo = params
    h = jax.nn.relu(x @ w0 + b0)
    h = jax.nn.relu(h @ w1 + b1)
    h = jax.nn.relu(h @ w2 + b2)
    h = jax.nn.relu(jnp.concatenate([h, x], axis=-1) @ w3 + b3)
    return h @ wo + bo                                              # (1, 6)


def _skew(w):
    wx, wy, wz = w[0], w[1], w[2]
    z = jnp.zeros_like(wx)
    return jnp.stack([
        jnp.stack([z, -wz, wy]),
        jnp.stack([wz, z, -wx]),
        jnp.stack([-wy, wx, z]),
    ])


def exp_se3(screw_axis, theta):
    # screw_axis = [w, v] with |w| = 1; returns a 4x4 SE(3) matrix.
    w, v = screw_axis[:3], screw_axis[3:]
    W = _skew(w)
    WW = W @ W
    s, c = jnp.sin(theta), jnp.cos(theta)
    eye3 = jnp.eye(3, dtype=jnp.float32)
    R = eye3 + s * W + (1.0 - c) * WW
    G = theta * eye3 + (1.0 - c) * W + (theta - s) * WW
    p = G @ v
    top = jnp.concatenate([R, p[:, None]], axis=1)
    bottom = jnp.array([[0.0, 0.0, 0.0, 1.0]], dtype=jnp.float32)
    return jnp.concatenate([top, bottom], axis=0)


@jax.jit
def se3_field_forward(pts, emb_weight, mlp_params):
    """Forward of SE3Field; pts: (N, 3) f32 -> warped (N, 3) f32."""
    # embedding(zeros(1, long)) -> row 0 of the (1, 6) embedding table.
    out = mlp_forward(emb_weight[0][None, :], mlp_params)[0]        # (6,)

    w, v = out[:3], out[3:]
    theta = jnp.linalg.norm(w)
    # NOTE: matches the PyTorch reference (no epsilon); theta == 0 would NaN
    # there as well.
    w = w / theta
    v = v / theta
    T = exp_se3(jnp.concatenate([w, v]), theta)                     # (4, 4)

    # Flatten the transform to 12 SMEM scalars: R row-major, then p.
    tmat = jnp.concatenate([T[:3, :3].reshape(-1), T[:3, 3]])       # (12,)
    return warp_points(pts, tmat)


def init_params(key):
    ks = jax.random.split(key, 7)

    def lin(k, fan_in, fan_out):
        bound = 1.0 / math.sqrt(fan_in)
        kw, kb = jax.random.split(k)
        W = jax.random.uniform(kw, (fan_in, fan_out), jnp.float32, -bound, bound)
        b = jax.random.uniform(kb, (fan_out,), jnp.float32, -bound, bound)
        return W, b

    emb = jax.random.normal(ks[0], (1, 6), jnp.float32)             # nn.Embedding(1, 6)
    w0, b0 = lin(ks[1], 6, 64)
    w1, b1 = lin(ks[2], 64, 64)
    w2, b2 = lin(ks[3], 64, 64)
    w3, b3 = lin(ks[4], 64 + 6, 64)                                 # skip-concat layer
    wo, bo = lin(ks[5], 64, 6)
    return emb, (w0, b0, w1, b1, w2, b2, w3, b3, wo, bo)


# ----------------------------------------------------------------------------
# Pure-JAX reference (AoS layout, homogeneous matmul) for validation.
# ----------------------------------------------------------------------------
def _reference(pts, emb_weight, mlp_params):
    out = mlp_forward(emb_weight[0][None, :], mlp_params)[0]
    w, v = out[:3], out[3:]
    theta = jnp.linalg.norm(w)
    w, v = w / theta, v / theta
    T = exp_se3(jnp.concatenate([w, v]), theta)
    hom = jnp.concatenate([pts, jnp.ones((pts.shape[0], 1), jnp.float32)], axis=1)
    return (hom @ T.T)[:, :3]


if __name__ == "__main__":
    key = jax.random.PRNGKey(0)
    k_params, k_pts = jax.random.split(key)

    emb_weight, mlp_params = init_params(k_params)

    # Two sizes: one that divides the lane width exactly (multi-step grid) and
    # one ragged size (pad path + masked edge block in the grid).
    for n in (16384, 5000):
        pts = jax.random.normal(jax.random.fold_in(k_pts, n), (n, 3), jnp.float32)

        warped = se3_field_forward(pts, emb_weight, mlp_params)
        warped = jax.block_until_ready(warped)

        ref = _reference(pts, emb_weight, mlp_params)
        assert warped.shape == (n, 3) and warped.dtype == jnp.float32
        err = float(jnp.max(jnp.abs(warped - ref)))
        assert jnp.allclose(warped, ref, rtol=1e-3, atol=1e-3), err

    print("KERNEL_OK")
</pallas_src>

<mosaic_0001>
module attributes {stable_mosaic.version = 11 : i64} {
  func.func @_warp_kernel(%arg0: i32, %arg1: memref<12xf32, #tpu.memory_space<smem>>, %arg2: memref<3x8x512xf32, #tpu.memory_space<vmem>>, %arg3: memref<3x8x512xf32, #tpu.memory_space<vmem>>) attributes {dimension_semantics = [#tpu.dimension_semantics<parallel>], iteration_bounds = array<i64: 4>, scalar_prefetch = 0 : i64, scratch_operands = 0 : i64, tpu.core_type = #tpu.core_type<tc>, window_params = [{transform_indices = @transform_0, window_bounds = array<i64: 12>}, {transform_indices = @transform_1, window_bounds = array<i64: 3, 8, 512>}, {transform_indices = @transform_2, window_bounds = array<i64: 3, 8, 512>}]} {
    %c0 = arith.constant 0 : index
    %c0_0 = arith.constant 0 : index
    %c0_1 = arith.constant 0 : index
    %0 = vector.load %arg2[%c0, %c0_0, %c0_1] : memref<3x8x512xf32, #tpu.memory_space<vmem>>, vector<1x8x512xf32>
    %1 = vector.shape_cast %0 : vector<1x8x512xf32> to vector<8x512xf32>
    %c1 = arith.constant 1 : index
    %c0_2 = arith.constant 0 : index
    %c0_3 = arith.constant 0 : index
    %2 = vector.load %arg2[%c1, %c0_2, %c0_3] : memref<3x8x512xf32, #tpu.memory_space<vmem>>, vector<1x8x512xf32>
    %3 = vector.shape_cast %2 : vector<1x8x512xf32> to vector<8x512xf32>
    %c2 = arith.constant 2 : index
    %c0_4 = arith.constant 0 : index
    %c0_5 = arith.constant 0 : index
    %4 = vector.load %arg2[%c2, %c0_4, %c0_5] : memref<3x8x512xf32, #tpu.memory_space<vmem>>, vector<1x8x512xf32>
    %5 = vector.shape_cast %4 : vector<1x8x512xf32> to vector<8x512xf32>
    %c0_6 = arith.constant 0 : index
    %6 = memref.load %arg1[%c0_6] : memref<12xf32, #tpu.memory_space<smem>>
    %7 = vector.broadcast %6 : f32 to vector<8x512xf32>
    %8 = arith.mulf %7, %1 : vector<8x512xf32>
    %c1_7 = arith.constant 1 : index
    %9 = memref.load %arg1[%c1_7] : memref<12xf32, #tpu.memory_space<smem>>
    %10 = vector.broadcast %9 : f32 to vector<8x512xf32>
    %11 = arith.mulf %10, %3 : vector<8x512xf32>
    %12 = arith.addf %8, %11 : vector<8x512xf32>
    %c2_8 = arith.constant 2 : index
    %13 = memref.load %arg1[%c2_8] : memref<12xf32, #tpu.memory_space<smem>>
    %14 = vector.broadcast %13 : f32 to vector<8x512xf32>
    %15 = arith.mulf %14, %5 : vector<8x512xf32>
    %16 = arith.addf %12, %15 : vector<8x512xf32>
    %c9 = arith.constant 9 : index
    %17 = memref.load %arg1[%c9] : memref<12xf32, #tpu.memory_space<smem>>
    %18 = vector.broadcast %17 : f32 to vector<8x512xf32>
    %19 = arith.addf %16, %18 : vector<8x512xf32>
    %c0_9 = arith.constant 0 : index
    %c0_10 = arith.constant 0 : index
    %c0_11 = arith.constant 0 : index
    %20 = vector.load %arg3[%c0_9, %c0_10, %c0_11] : memref<3x8x512xf32, #tpu.memory_space<vmem>>, vector<1x8x512xf32>
    %21 = vector.shape_cast %20 : vector<1x8x512xf32> to vector<8x512xf32>
    %22 = vector.shape_cast %19 : vector<8x512xf32> to vector<1x8x512xf32>
    tpu.vector_store %arg3[%c0_9, %c0_10, %c0_11], %22 {strides = array<i32>} : memref<3x8x512xf32, #tpu.memory_space<vmem>>, vector<1x8x512xf32>,
    %c3 = arith.constant 3 : index
    %23 = memref.load %arg1[%c3] : memref<12xf32, #tpu.memory_space<smem>>
    %24 = vector.broadcast %23 : f32 to vector<8x512xf32>
    %25 = arith.mulf %24, %1 : vector<8x512xf32>
    %c4 = arith.constant 4 : index
    %26 = memref.load %arg1[%c4] : memref<12xf32, #tpu.memory_space<smem>>
    %27 = vector.broadcast %26 : f32 to vector<8x512xf32>
    %28 = arith.mulf %27, %3 : vector<8x512xf32>
    %29 = arith.addf %25, %28 : vector<8x512xf32>
    %c5 = arith.constant 5 : index
    %30 = memref.load %arg1[%c5] : memref<12xf32, #tpu.memory_space<smem>>
    %31 = vector.broadcast %30 : f32 to vector<8x512xf32>
    %32 = arith.mulf %31, %5 : vector<8x512xf32>
    %33 = arith.addf %29, %32 : vector<8x512xf32>
    %c10 = arith.constant 10 : index
    %34 = memref.load %arg1[%c10] : memref<12xf32, #tpu.memory_space<smem>>
    %35 = vector.broadcast %34 : f32 to vector<8x512xf32>
    %36 = arith.addf %33, %35 : vector<8x512xf32>
    %c1_12 = arith.constant 1 : index
    %c0_13 = arith.constant 0 : index
    %c0_14 = arith.constant 0 : index
    %37 = vector.load %arg3[%c1_12, %c0_13, %c0_14] : memref<3x8x512xf32, #tpu.memory_space<vmem>>, vector<1x8x512xf32>
    %38 = vector.shape_cast %37 : vector<1x8x512xf32> to vector<8x512xf32>
    %39 = vector.shape_cast %36 : vector<8x512xf32> to vector<1x8x512xf32>
    tpu.vector_store %arg3[%c1_12, %c0_13, %c0_14], %39 {strides = array<i32>} : memref<3x8x512xf32, #tpu.memory_space<vmem>>, vector<1x8x512xf32>,
    %c6 = arith.constant 6 : index
    %40 = memref.load %arg1[%c6] : memref<12xf32, #tpu.memory_space<smem>>
    %41 = vector.broadcast %40 : f32 to vector<8x512xf32>
    %42 = arith.mulf %41, %1 : vector<8x512xf32>
    %c7 = arith.constant 7 : index
    %43 = memref.load %arg1[%c7] : memref<12xf32, #tpu.memory_space<smem>>
    %44 = vector.broadcast %43 : f32 to vector<8x512xf32>
    %45 = arith.mulf %44, %3 : vector<8x512xf32>
    %46 = arith.addf %42, %45 : vector<8x512xf32>
    %c8 = arith.constant 8 : index
    %47 = memref.load %arg1[%c8] : memref<12xf32, #tpu.memory_space<smem>>
    %48 = vector.broadcast %47 : f32 to vector<8x512xf32>
    %49 = arith.mulf %48, %5 : vector<8x512xf32>
    %50 = arith.addf %46, %49 : vector<8x512xf32>
    %c11 = arith.constant 11 : index
    %51 = memref.load %arg1[%c11] : memref<12xf32, #tpu.memory_space<smem>>
    %52 = vector.broadcast %51 : f32 to vector<8x512xf32>
    %53 = arith.addf %50, %52 : vector<8x512xf32>
    %c2_15 = arith.constant 2 : index
    %c0_16 = arith.constant 0 : index
    %c0_17 = arith.constant 0 : index
    %54 = vector.load %arg3[%c2_15, %c0_16, %c0_17] : memref<3x8x512xf32, #tpu.memory_space<vmem>>, vector<1x8x512xf32>
    %55 = vector.shape_cast %54 : vector<1x8x512xf32> to vector<8x512xf32>
    %56 = vector.shape_cast %53 : vector<8x512xf32> to vector<1x8x512xf32>
    tpu.vector_store %arg3[%c2_15, %c0_16, %c0_17], %56 {strides = array<i32>} : memref<3x8x512xf32, #tpu.memory_space<vmem>>, vector<1x8x512xf32>,
    return
  }
  func.func @transform_0(%arg0: i32) -> i32 {
    %c0_i32 = arith.constant 0 : i32
    %c0_i32_0 = arith.constant 0 : i32
    return %c0_i32 : i32
  }
  func.func @transform_1(%arg0: i32) -> (i32, i32, i32) {
    %c0_i32 = arith.constant 0 : i32
    %c0_i32_0 = arith.constant 0 : i32
    %c0_i32_1 = arith.constant 0 : i32
    return %c0_i32, %arg0, %c0_i32_0 : i32, i32, i32
  }
  func.func @transform_2(%arg0: i32) -> (i32, i32, i32) {
    %c0_i32 = arith.constant 0 : i32
    %c0_i32_0 = arith.constant 0 : i32
    %c0_i32_1 = arith.constant 0 : i32
    return %c0_i32, %arg0, %c0_i32_0 : i32, i32, i32
  }
}

</mosaic_0001>

<bundles_post_ra>
// kernel: se3_field_forward.1
= control target key start
LH: loop header
LB: loop body
LE: loop exit
PB: predicated region body
PF: predicated region fallthrough
CT: control target
= control target key end

     0   :  { %7 = vsyncpa [#allocation3], 0  ;;  %s573_s9 = smov 0   ;;  %s575_s10 = smov 0   ;;  %s771_s0 = inlined_call_operand.vmem [shape: f32[12], index: 0, kind: input, shape index: {}]   ;;  %s772_s1 = inlined_call_operand.vmem [shape: f32[3,32,512], index: 1, kind: input, shape index: {}]   ;;  %s773_s2 = inlined_call_operand.vmem [shape: f32[3,32,512], index: 2, kind: output, shape index: {}]  }
   0x1   :  { %s577_s11 = smov 0  }
   0x2 LB: > { %s589_s12 = sadd.s32 4294967295, %s555_s11   ;;  %s592_s13 = sadd.s32 1, %s555_s11   ;;  %s555_s11 = sphi %s577_s11, %s780_s11   ;;  %s551_s10 = sphi %s575_s10, %s779_s10   ;;  %s547_s9 = sphi %s573_s9, %s778_s9  }
   0x3   : > { %s38_s14 = ssub.s32 %s555_s11, %s592_s13  ;;  %s41_s15 = sadd.s32 1, %s551_s10 }
   0x4   : > { %p39_p0 = scmp.eq.s32.totalorder %s38_s14, 0  ;;  %p48_p1 = scmp.ne.s32.totalorder %s551_s10, %s547_s9 }
   0x5   : > { %p49_p2 = scmp.eq.s32.totalorder %s555_s11, 0  ;;  %p78_p3 = scmp.eq.s32.totalorder %s589_s12, 3 }
   0x6   : > { %s602_s16 = scalar_select %p39_p0, %s551_s10, %s41_s15  }
   0x7   : > { %p604_p4 = por %p49_p2, %p48_p1  ;;  %p608_p5 = por %p78_p3, %p48_p1 }
   0x8   : > { %p437_p6 = scmp.ge.s32.totalorder %s555_s11, 1  ;;  %p91_p7 = scmp.lt.s32.totalorder %s555_s11, 5 }
   0x9   : > { %s775_s18 = scalar_select %p608_p5, 1, 0 }
   0xa   : > { %p487_p8 = scmp.eq.s32.totalorder %s589_s12, 0  ;;  %p615_p9 = pnand %p437_p6, %p91_p7 }
   0xb   : > { %s104_s22 = sshll.u32 %s771_s0, 4  ;;  %s105_s22 = int_to_ptr.vmem [resolvable:$true] %s104_s22 }
   0xc   : > { %p483_p10 = pneg %p615_p9  ;;  %s514_s23 = scalar_lea.vmem %s105_s22, 16 }
   0xd   : > { %p515_p12 = scmp.ne.s32.totalorder %s105_s22, %s514_s23  ;;  %p522_p2 = scmp.lt.s32.totalorder %s105_s22, %s105_s22 }
   0xe   : > { %p484_p11 = pnand %p487_p8, %p483_p10  ;;  %p523_p3 = scmp.lt.s32.totalorder %s514_s23, %s514_s23 }
  0x10   : > { %p516_p13 = pneg %p484_p11  ;;  %p524_p6 = por %p523_p3, %p522_p2 }
  0x12   : > { %p517_p0 = pnand %p516_p13, %p515_p12 }
  0x14   : > { %p518_p1 = pneg %p517_p0 }
  0x16   : > { %p525_p7 = pnand %p524_p6, %p518_p1 }
  0x18   : > { %528 = shalt.err (!%p525_p7)
}
  0x19   : > { %s557_s24 = smov [#allocation2]   ;;  %p439_p5 = scmp.ge.s32.totalorder %s555_s11, 4 }
  0x1a   : > { %486 = dma.vmem_to_smem (!%p484_p11), %s105_s22, 16, %s557_s24, [#allocation3]  }
  0x1b   : > { %111 = sbr.rel (%p439_p5) target bundleno = 45 (0x2d), region = 20 }
  0x22   : > { %114 = sbr.rel (!%p604_p4) target bundleno = 45 (0x2d), region = 24  ;;  %s116_s25 = sand.u32 (%p604_p4), 1, %s551_s10  }
  0x23   : > { %s475_s26 = sshll.u32 (%p604_p4), %s555_s11, 5  ;;  %s477_s27 = smul.u32 (%p604_p4), 96, %s116_s25 }
  0x24   : > { %s121_s30 = scalar_lea.vmem (%p604_p4), %s772_s1, %s475_s26 }
  0x25   : > { %v134_v0 = vld [vmem:[%s121_s30] sm:$0xff] (%p604_p4)  ;;  %v136_v1 = vld [vmem:[%s121_s30 + $0x8] sm:$0xff] (%p604_p4)  ;;  %v138_v2 = vld [vmem:[%s121_s30 + $0x10] sm:$0xff] (%p604_p4)  ;;  %s118_s3 = scalar_lea.vmem (%p604_p4), [#allocation4], %s477_s27 }
  0x26   : > { %v140_v3 = vld [vmem:[%s121_s30 + $0x18] sm:$0xff] (%p604_p4)  ;;  %v142_v4 = vld [vmem:[%s121_s30 + $0x80] sm:$0xff] (%p604_p4)  ;;  %v144_v5 = vld [vmem:[%s121_s30 + $0x88] sm:$0xff] (%p604_p4)  ;;  %135 = vst [vmem:[%s118_s3] sm:$0xff] (%p604_p4), %v134_v0 }
  0x27   : > { %137 = vst [vmem:[%s118_s3 + $0x8] sm:$0xff] (%p604_p4), %v136_v1  ;;  %139 = vst [vmem:[%s118_s3 + $0x10] sm:$0xff] (%p604_p4), %v138_v2  ;;  %v146_v6 = vld [vmem:[%s121_s30 + $0x90] sm:$0xff] (%p604_p4)  ;;  %v148_v7 = vld [vmem:[%s121_s30 + $0x98] sm:$0xff] (%p604_p4) }
  0x28   : > { %141 = vst [vmem:[%s118_s3 + $0x18] sm:$0xff] (%p604_p4), %v140_v3  ;;  %143 = vst [vmem:[%s118_s3 + $0x20] sm:$0xff] (%p604_p4), %v142_v4  ;;  %v150_v8 = vld [vmem:[%s121_s30 + $0x100] sm:$0xff] (%p604_p4)  ;;  %v152_v9 = vld [vmem:[%s121_s30 + $0x108] sm:$0xff] (%p604_p4) }
  0x29   : > { %145 = vst [vmem:[%s118_s3 + $0x28] sm:$0xff] %v144_v5  ;;  %147 = vst [vmem:[%s118_s3 + $0x30] sm:$0xff] %v146_v6  ;;  %v154_v10 = vld [vmem:[%s121_s30 + $0x110] sm:$0xff]  ;;  %v156_v11 = vld [vmem:[%s121_s30 + $0x118] sm:$0xff] }
  0x2a   : > { %149 = vst [vmem:[%s118_s3 + $0x38] sm:$0xff] %v148_v7  ;;  %151 = vst [vmem:[%s118_s3 + $0x40] sm:$0xff] %v150_v8 }
  0x2b   : > { %153 = vst [vmem:[%s118_s3 + $0x48] sm:$0xff] %v152_v9  ;;  %155 = vst [vmem:[%s118_s3 + $0x50] sm:$0xff] %v154_v10 }
  0x2c   : > { %157 = vst [vmem:[%s118_s3 + $0x58] sm:$0xff] %v156_v11 }
  0x2d PF: > { %166 = sbr.rel (%p615_p9) target bundleno = 99 (0x63), region = 47 }
  0x34   : > { %542 = dma.done.wait (%p487_p8), [#allocation3], 16  }
  0x35   : > { %544 = vsyncadd (%p487_p8), [#allocation3], 4294967280  ;;  %s173_s4 = sand.u32 1, %s547_s9  }
  0x36   : > { %s641_s5 = smul.u32 96, %s173_s4 }
  0x38   : > { %s175_s6 = scalar_lea.vmem [#allocation4], %s641_s5 }
  0x39   : > { %179 = sfence }
  0x3a   : > { %s208_s7 = sld [smem:[#allocation2]]  ;;  %s452_s8 = sld [smem:[#allocation2 + $0x1]]  ;;  %v644_v12 = vld [vmem:[%s175_s6] sm:$0xff]  ;;  %v652_v15 = vld [vmem:[%s175_s6 + $0x8] sm:$0xff]  ;;  %v664_v19 = vld [vmem:[%s175_s6 + $0x10] sm:$0xff] }
  0x3b   : > { %s453_s11 = sld [smem:[#allocation2 + $0x2]]  ;;  %s454_s14 = sld [smem:[#allocation2 + $0x9]]  ;;  %v648_v13 = vld [vmem:[%s175_s6 + $0x20] sm:$0xff]  ;;  %v656_v16 = vld [vmem:[%s175_s6 + $0x28] sm:$0xff]  ;;  %v666_v20 = vld [vmem:[%s175_s6 + $0x30] sm:$0xff] }
  0x3c   : > { %s646_s15 = sld [smem:[#allocation2 + $0x3]]  ;;  %v650_v14 = vld [vmem:[%s175_s6 + $0x40] sm:$0xff]  ;;  %s654_s9 = sld [smem:[#allocation2 + $0x4]]  ;;  %v658_v17 = vld [vmem:[%s175_s6 + $0x48] sm:$0xff]  ;;  %v668_v21 = vld [vmem:[%s175_s6 + $0x50] sm:$0xff] }
  0x3d   : > { %s660_s17 = sld [smem:[#allocation2 + $0x5]]  ;;  %s662_s19 = sld [smem:[#allocation2 + $0xa]]  ;;  %v672_v26 = vld [vmem:[%s175_s6 + $0x18] sm:$0xff] }
  0x3e   : > { %v674_v27 = vld [vmem:[%s175_s6 + $0x38] sm:$0xff]  ;;  %s687_s20 = sld [smem:[#allocation2 + $0x6]]  ;;  %s692_s21 = sld [smem:[#allocation2 + $0x7]] }
  0x3f   : > { %v679_v32 = vld [vmem:[%s175_s6 + $0x58] sm:$0xff]  ;;  %s695_s22 = sld [smem:[#allocation2 + $0x8]]  ;;  %s700_s23 = sld [smem:[#allocation2 + $0xb]] }
  0x40   : > { %v209_v18 = vstv %s208_s7  ;;  %v215_v23 = vstv %s452_s8  ;;  %s706_s24 = scalar_lea.vmem [#allocation5], %s641_s5  ;;  %p777_p4 = scmp.ne.s32.totalorder %s775_s18, 0 }
  0x41   : > { %v210_v22 = vmul.f32 %v209_v18, %v644_v12  ;;  %v225_v24 = vstv %s453_s11  ;;  %v211_v25 = vmul.f32 %v209_v18, %v652_v15  ;;  %v216_v28 = vmul.f32 %v648_v13, %v215_v23  ;;  %s476_s25 = sshll.u32 (%p777_p4), %s589_s12, 5 }
  0x42   : > { %v226_v29 = vmul.f32 %v650_v14, %v225_v24  ;;  %v235_v30 = vstv %s454_s14  ;;  %v217_v31 = vmul.f32 %v656_v16, %v215_v23  ;;  %v227_v33 = vmul.f32 %v658_v17, %v225_v24  ;;  %s327_s28 = scalar_lea.vmem (%p777_p4), %s773_s2, %s476_s25 }
  0x43   : > { %v212_v34 = vmul.f32 %v209_v18, %v664_v19  ;;  %v218_v35 = vmul.f32 %v666_v20, %v215_v23  ;;  %v228_v36 = vmul.f32 %v668_v21, %v225_v24  ;;  %v220_v37 = vadd.f32 %v216_v28, %v210_v22 }
  0x44   : > { %v221_v38 = vadd.f32 %v217_v31, %v211_v25  ;;  %v213_v39 = vmul.f32 %v209_v18, %v672_v26  ;;  %v219_v40 = vmul.f32 %v674_v27, %v215_v23  ;;  %v229_v42 = vmul.f32 %v679_v32, %v225_v24 }
  0x45   : > { %v222_v41 = vadd.f32 %v218_v35, %v212_v34  ;;  %v245_v43 = vstv %s646_s15  ;;  %v251_v44 = vstv %s654_s9  ;;  %v230_v45 = vadd.f32 %v226_v29, %v220_v37 }
  0x46   : > { %v231_v46 = vadd.f32 %v227_v33, %v221_v38  ;;  %v223_v47 = vadd.f32 %v219_v40, %v213_v39  ;;  %v246_v48 = vmul.f32 %v245_v43, %v644_v12  ;;  %v252_v50 = vmul.f32 %v648_v13, %v251_v44 }
  0x47   : > { %v232_v49 = vadd.f32 %v228_v36, %v222_v41  ;;  %v261_v51 = vstv %s660_s17  ;;  %v271_v52 = vstv %s662_s19  ;;  %v236_v53 = vadd.f32 %v235_v30, %v230_v45 }
  0x48   : > { %v237_v54 = vadd.f32 %v235_v30, %v231_v46  ;;  %v233_v55 = vadd.f32 %v229_v42, %v223_v47  ;;  %v262_v56 = vmul.f32 %v650_v14, %v261_v51  ;;  %v256_v58 = vadd.f32 %v252_v50, %v246_v48 }
  0x49   : > { %v238_v57 = vadd.f32 %v235_v30, %v232_v49  ;;  %v247_v59 = vmul.f32 %v245_v43, %v652_v15  ;;  %v253_v60 = vmul.f32 %v656_v16, %v251_v44  ;;  %240 = vst [vmem:[%s706_s24] sm:$0xff] %v236_v53  ;;  %v263_v62 = vmul.f32 %v658_v17, %v261_v51 }
  0x4a   : > { %241 = vst [vmem:[%s706_s24 + $0x8] sm:$0xff] %v237_v54  ;;  %v239_v61 = vadd.f32 %v235_v30, %v233_v55  ;;  %v248_v63 = vmul.f32 %v245_v43, %v664_v19  ;;  %v254_v0 = vmul.f32 %v666_v20, %v251_v44  ;;  %v266_v1 = vadd.f32 %v262_v56, %v256_v58 }
  0x4b   : > { %242 = vst [vmem:[%s706_s24 + $0x10] sm:$0xff] %v238_v57  ;;  %v257_v2 = vadd.f32 %v253_v60, %v247_v59  ;;  %v264_v3 = vmul.f32 %v668_v21, %v261_v51  ;;  %v249_v4 = vmul.f32 %v245_v43, %v672_v26  ;;  %v255_v6 = vmul.f32 %v674_v27, %v251_v44 }
  0x4c   : > { %243 = vst [vmem:[%s706_s24 + $0x18] sm:$0xff] %v239_v61  ;;  %v258_v5 = vadd.f32 %v254_v0, %v248_v63  ;;  %v265_v7 = vmul.f32 %v679_v32, %v261_v51  ;;  %v282_v8 = vstv %s687_s20  ;;  %v272_v9 = vadd.f32 %v271_v52, %v266_v1 }
  0x4d   : > { %v267_v10 = vadd.f32 %v263_v62, %v257_v2  ;;  %v283_v11 = vmul.f32 %v282_v8, %v644_v12  ;;  %v288_v18 = vstv %s692_s21  ;;  %v259_v23 = vadd.f32 %v255_v6, %v249_v4 }
  0x4e   : > { %v268_v22 = vadd.f32 %v264_v3, %v258_v5  ;;  %v289_v24 = vmul.f32 %v648_v13, %v288_v18  ;;  %v298_v25 = vstv %s695_s22  ;;  %459 = vst [vmem:[%s706_s24 + $0x20] sm:$0xff] %v272_v9  ;;  %v308_v30 = vstv %s700_s23 }
  0x4f   : > { %v273_v28 = vadd.f32 %v271_v52, %v267_v10  ;;  %v299_v29 = vmul.f32 %v650_v14, %v298_v25  ;;  %v284_v31 = vmul.f32 %v282_v8, %v652_v15  ;;  %v269_v34 = vadd.f32 %v265_v7, %v259_v23 }
  0x50   : > { %v274_v33 = vadd.f32 %v271_v52, %v268_v22  ;;  %v293_v35 = vadd.f32 %v289_v24, %v283_v11  ;;  %v290_v12 = vmul.f32 %v656_v16, %v288_v18  ;;  %v300_v36 = vmul.f32 %v658_v17, %v298_v25 }
  0x51   : > { %460 = vst [vmem:[%s706_s24 + $0x28] sm:$0xff] %v273_v28  ;;  %v285_v13 = vmul.f32 %v282_v8, %v664_v19  ;;  %v291_v37 = vmul.f32 %v666_v20, %v288_v18  ;;  %v301_v38 = vmul.f32 %v668_v21, %v298_v25  ;;  %v275_v14 = vadd.f32 %v271_v52, %v269_v34 }
  0x52   : > { %461 = vst [vmem:[%s706_s24 + $0x30] sm:$0xff] %v274_v33  ;;  %v303_v15 = vadd.f32 %v299_v29, %v293_v35  ;;  %v294_v39 = vadd.f32 %v290_v12, %v284_v31  ;;  %v286_v40 = vmul.f32 %v282_v8, %v672_v26  ;;  %v292_v41 = vmul.f32 %v674_v27, %v288_v18  ;;  %v340_v26 = vld [vmem:[%s706_s24] sm:$0xff] (%p777_p4)  ;;  %v342_v27 = vld [vmem:[%s706_s24 + $0x8] sm:$0xff] (%p777_p4) }
  0x53   : > { %v295_v16 = vadd.f32 %v291_v37, %v285_v13  ;;  %v302_v17 = vmul.f32 %v679_v32, %v298_v25  ;;  %462 = vst [vmem:[%s706_s24 + $0x38] sm:$0xff] %v275_v14  ;;  %v344_v32 = vld [vmem:[%s706_s24 + $0x10] sm:$0xff] (%p777_p4)  ;;  %v346_v47 = vld [vmem:[%s706_s24 + $0x18] sm:$0xff] (%p777_p4)  ;;  %341 = vst [vmem:[%s327_s28] sm:$0xff] (%p777_p4), %v340_v26 }
  0x54   : > { %v309_v19 = vadd.f32 %v308_v30, %v303_v15  ;;  %v304_v42 = vadd.f32 %v300_v36, %v294_v39  ;;  %v296_v43 = vadd.f32 %v292_v41, %v286_v40  ;;  %324 = sbr.rel (!%p777_p4) target bundleno = 99 (0x63), region = 59  ;;  %343 = vst [vmem:[%s327_s28 + $0x8] sm:$0xff] (%p777_p4), %v342_v27  ;;  %345 = vst [vmem:[%s327_s28 + $0x10] sm:$0xff] (%p777_p4), %v344_v32 }
  0x55   : > { %v305_v20 = vadd.f32 %v301_v38, %v295_v16  ;;  %v348_v48 = vld [vmem:[%s706_s24 + $0x20] sm:$0xff] (%p777_p4)  ;;  %347 = vst [vmem:[%s327_s28 + $0x18] sm:$0xff] (%p777_p4), %v346_v47 }
  0x56   : > { %467 = vst [vmem:[%s706_s24 + $0x40] sm:$0xff] %v309_v19  ;;  %v310_v21 = vadd.f32 %v308_v30, %v304_v42  ;;  %v306_v45 = vadd.f32 %v302_v17, %v296_v43  ;;  %349 = vst [vmem:[%s327_s28 + $0x80] sm:$0xff] (%p777_p4), %v348_v48 }
  0x57   : > { %v311_v44 = vadd.f32 %v308_v30, %v305_v20 }
  0x58   : > { %468 = vst [vmem:[%s706_s24 + $0x48] sm:$0xff] %v310_v21  ;;  %v312_v46 = vadd.f32 %v308_v30, %v306_v45  ;;  %v350_v49 = vld [vmem:[%s706_s24 + $0x28] sm:$0xff] (%p777_p4) }
  0x59   : > { %469 = vst [vmem:[%s706_s24 + $0x50] sm:$0xff] %v311_v44  ;;  %351 = vst [vmem:[%s327_s28 + $0x88] sm:$0xff] (%p777_p4), %v350_v49  ;;  %v352_v50 = vld [vmem:[%s706_s24 + $0x30] sm:$0xff] (%p777_p4) }
  0x5a   : > { %470 = vst [vmem:[%s706_s24 + $0x58] sm:$0xff] %v312_v46  ;;  %v354_v51 = vld [vmem:[%s706_s24 + $0x38] sm:$0xff] (%p777_p4)  ;;  %353 = vst [vmem:[%s327_s28 + $0x90] sm:$0xff] (%p777_p4), %v352_v50 }
  0x5b   : > { %355 = vst [vmem:[%s327_s28 + $0x98] sm:$0xff] %v354_v51 }
  0x5d   : > { %v356_v52 = vld [vmem:[%s706_s24 + $0x40] sm:$0xff] }
  0x5e   : > { %357 = vst [vmem:[%s327_s28 + $0x100] sm:$0xff] %v356_v52 }
  0x5f   : > { %v358_v53 = vld [vmem:[%s706_s24 + $0x48] sm:$0xff] }
  0x60   : > { %v360_v54 = vld [vmem:[%s706_s24 + $0x50] sm:$0xff]  ;;  %359 = vst [vmem:[%s327_s28 + $0x108] sm:$0xff] %v358_v53 }
  0x61   : > { %v362_v55 = vld [vmem:[%s706_s24 + $0x58] sm:$0xff]  ;;  %361 = vst [vmem:[%s327_s28 + $0x110] sm:$0xff] %v360_v54 }
  0x62   : > { %363 = vst [vmem:[%s327_s28 + $0x118] sm:$0xff] %v362_v55 }
  0x63 PF: > { %p10_p5 = scmp.ge.s32.totalorder %s592_s13, 6   ;;  %s778_s9 = smov %s551_s10 }
  0x64   : > { %s779_s10 = smov %s602_s16  ;;  %s780_s11 = smov %s592_s13 }
  0x65   :  { %12 = sbr.rel (!%p10_p5) target bundleno = 2 (0x2), region = 118 }
  0x6c   :  { %379 = vsyncpa [#allocation3], 1 }
  0x6d   :  { %381 = vsyncpa [#allocation3 + $0x1], 1 }

</bundles_post_ra>
